<compile_context>
chip_gen: v7x
topology: tpu7x:2x2x1
jax: 0.10.0
libtpu: 0.0.40
codegen_flags: <defaults>
</compile_context>

<pallas_src>
import functools

import jax
import jax.numpy as jnp
from jax import lax
from jax.experimental import pallas as pl
from jax.experimental.pallas import tpu as pltpu

TEMPERATURE = 0.07
MARGIN = 1.0           # unused in the PyTorch forward (kept for parity)
_EPS = 1e-12           # F.normalize default eps
_EPS2 = _EPS * _EPS
_LANES = 128
_SUBLANES = 8
_DEFAULT_TILE_B = 4096  # a lane-dense [16, TB] f32 block is only 64*TB bytes


# --------------------------------------------------------------------------
# planning helpers
# --------------------------------------------------------------------------
def _plan_tiles(b, tile_hint=None, max_splits=2):
    """Choose (tile_b, splits, tiles_per_split, padded_b).

    tile_b is a multiple of 128 (batch lives on the lane axis), the padded
    batch covers a whole number of tiles, and tiles are optionally split
    across TensorCores (v7x megacore) via a leading "parallel" grid axis.
    """
    target = _DEFAULT_TILE_B if tile_hint is None else max(
        pl.cdiv(int(tile_hint), _LANES) * _LANES, _LANES)
    b_lanes = pl.cdiv(b, _LANES) * _LANES
    tile_b = min(target, b_lanes)
    n_tiles = pl.cdiv(b_lanes, tile_b)
    splits = max_splits if (max_splits > 1 and n_tiles >= max_splits) else 1
    n_tiles = pl.cdiv(n_tiles, splits) * splits    # pad with all-zero tiles
    tiles_per_split = n_tiles // splits
    return tile_b, splits, tiles_per_split, n_tiles * tile_b


def _vmem_limit_bytes(tile_b, n_neg, d):
    """Conservative scoped-VMEM budget for the lane-dense layout."""
    dpad = pl.cdiv(max(d, 1), _SUBLANES) * _SUBLANES
    npad = pl.cdiv(max(n_neg, 1), _SUBLANES) * _SUBLANES
    streams = 2 * 2 * dpad * tile_b * 4        # mu_c / mu_n, double-buffered
    negs = 3 * npad * max(d, _LANES) * 4       # neg input (2 bufs) + scratch
    logits = 4 * npad * tile_b * 4             # [N, TB] sims / exp temporaries
    work = 6 * dpad * tile_b * 4               # normalized copies, diff, etc.
    outs = 4 * _SUBLANES * _LANES * 4
    budget = streams + negs + logits + work + outs + (2 << 20)
    # Cap well below v7x's 64 MiB physical per-TC VMEM; v5e/v6e (128 MiB)
    # are unaffected by the cap.
    return int(min(max(budget, 4 << 20), 48 << 20))


def _to_lane_major(x, padded_b):
    """[B, D] -> [D, B_pad]: batch on the lane axis, zero-padded (free-ish
    layout plumbing in the wrapper; padded columns contribute 0 downstream)."""
    xt = x.T
    b = x.shape[0]
    if padded_b != b:
        xt = jnp.pad(xt, ((0, 0), (0, padded_b - b)))
    return xt


# --------------------------------------------------------------------------
# kernels
# --------------------------------------------------------------------------
def _regime_loss_kernel(mu_c_ref, mu_n_ref, neg_ref, pred_ref, contr_ref,
                        ng_ref, *, true_b, tile_b, tiles_per_split):
    c = pl.program_id(0)          # TensorCore split axis ("parallel")
    i = pl.program_id(1)          # batch-tile loop ("arbitrary")

    @pl.when(i == 0)
    def _init():
        pred_ref[...] = jnp.zeros_like(pred_ref)
        contr_ref[...] = jnp.zeros_like(contr_ref)
        # Normalize the resident negatives ONCE (hoisted out of the tile loop).
        neg = neg_ref[...].astype(jnp.float32)                       # [N, D]
        ss = jnp.sum(neg * neg, axis=-1, keepdims=True)
        ng_ref[...] = neg * lax.rsqrt(jnp.maximum(ss, jnp.float32(_EPS2)))

    mu_c = mu_c_ref[...].astype(jnp.float32)                         # [D, TB]
    mu_n = mu_n_ref[...].astype(jnp.float32)                         # [D, TB]

    # ---- prediction loss partial (padded lanes are zero -> contribute 0) ----
    diff = mu_c - mu_n
    mse_part = jnp.sum(diff * diff)

    # ---- contrastive partial (InfoNCE with label 0) --------------------------
    inv_t = jnp.float32(1.0 / TEMPERATURE)
    ss_c = jnp.sum(mu_c * mu_c, axis=0, keepdims=True)               # [1, TB]
    ss_n = jnp.sum(mu_n * mu_n, axis=0, keepdims=True)               # [1, TB]
    # 1/temperature folded into mu_current's normalization scale.
    mc = mu_c * (lax.rsqrt(jnp.maximum(ss_c, jnp.float32(_EPS2))) * inv_t)
    mn = mu_n * lax.rsqrt(jnp.maximum(ss_n, jnp.float32(_EPS2)))

    pos_sim = jnp.sum(mc * mn, axis=0, keepdims=True)                # [1, TB]
    neg_sim = jnp.dot(ng_ref[...], mc,
                      preferred_element_type=jnp.float32)            # [N, TB]

    # cross_entropy with label 0  ==  logsumexp([pos, neg]) - pos
    m = jnp.maximum(pos_sim, jnp.max(neg_sim, axis=0, keepdims=True))
    sumexp = jnp.exp(pos_sim - m) + jnp.sum(jnp.exp(neg_sim - m),
                                            axis=0, keepdims=True)
    ce = m + jnp.log(sumexp) - pos_sim                               # [1, TB]

    # Mask padded batch lanes so they contribute exactly 0 to the CE sum.
    start = (c * tiles_per_split + i) * tile_b
    lane = lax.broadcasted_iota(jnp.int32, (1, tile_b), 1)
    ce = jnp.where(start + lane < true_b, ce, 0.0)

    pred_ref[...] += mse_part          # scalar broadcast over the (1,128) block
    contr_ref[...] += jnp.sum(ce)


def _mse_sum_kernel(xc_ref, xn_ref, out_ref):
    @pl.when(pl.program_id(1) == 0)
    def _init():
        out_ref[...] = jnp.zeros_like(out_ref)
    d = xc_ref[...].astype(jnp.float32) - xn_ref[...].astype(jnp.float32)
    out_ref[...] += jnp.sum(d * d)     # padded lanes are zero -> contribute 0


# --------------------------------------------------------------------------
# wrappers
# --------------------------------------------------------------------------
def _mse_loss(mu_current, mu_next, tile_hint, max_splits):
    b, d = mu_current.shape
    tile_b, splits, tiles_per_split, padded_b = _plan_tiles(
        b, tile_hint, max_splits)
    xc = _to_lane_major(mu_current, padded_b)
    xn = _to_lane_major(mu_next, padded_b)

    mu_spec = pl.BlockSpec((d, tile_b),
                           lambda c, i: (0, c * tiles_per_split + i))
    out_spec = pl.BlockSpec((1, _LANES), lambda c, i: (0, c))

    part = pl.pallas_call(
        _mse_sum_kernel,
        out_shape=jax.ShapeDtypeStruct((1, splits * _LANES), jnp.float32),
        grid=(splits, tiles_per_split),
        in_specs=[mu_spec, mu_spec],
        out_specs=out_spec,
        compiler_params=pltpu.CompilerParams(
            dimension_semantics=("parallel", "arbitrary"),
            vmem_limit_bytes=_vmem_limit_bytes(tile_b, 0, d)),
        cost_estimate=pl.CostEstimate(
            flops=3 * b * d, transcendentals=0,
            bytes_accessed=2 * padded_b * d * 4 + splits * _LANES * 4),
    )(xc, xn)
    return jnp.sum(part[0, ::_LANES]) / (b * d)


def regime_prediction_loss(mu_current, mu_next, negative_samples=None, *,
                           batch_tile=None, max_core_splits=2):
    """JAX/Pallas equivalent of RegimePredictionLoss.forward.

    Returns (prediction_loss, contrastive_loss) as f32 scalars.
    """
    b, d = mu_current.shape

    if negative_samples is None:
        return (_mse_loss(mu_current, mu_next, batch_tile, max_core_splits),
                jnp.float32(0.0))

    n = negative_samples.shape[0]
    tile_b, splits, tiles_per_split, padded_b = _plan_tiles(
        b, batch_tile, max_core_splits)

    mu_c_t = _to_lane_major(mu_current, padded_b)   # [D, B_pad] batch on lanes
    mu_n_t = _to_lane_major(mu_next, padded_b)

    kernel = functools.partial(_regime_loss_kernel, true_b=b, tile_b=tile_b,
                               tiles_per_split=tiles_per_split)

    mu_spec = pl.BlockSpec((d, tile_b),
                           lambda c, i: (0, c * tiles_per_split + i))
    # Resident block (constant index_map -> no re-DMA across the tile loop).
    neg_spec = pl.BlockSpec((n, d), lambda c, i: (0, 0))
    out_spec = pl.BlockSpec((1, _LANES), lambda c, i: (0, c))

    cost = pl.CostEstimate(
        flops=2 * b * n * d + 24 * b * d + 4 * n * d,
        transcendentals=b * (n + 4) + n,
        bytes_accessed=(2 * padded_b * d + n * d) * 4
                       + 2 * splits * _LANES * 4)

    pred_part, contr_part = pl.pallas_call(
        kernel,
        out_shape=(jax.ShapeDtypeStruct((1, splits * _LANES), jnp.float32),
                   jax.ShapeDtypeStruct((1, splits * _LANES), jnp.float32)),
        grid=(splits, tiles_per_split),
        in_specs=[mu_spec, mu_spec, neg_spec],
        out_specs=(out_spec, out_spec),
        scratch_shapes=[pltpu.VMEM((n, d), jnp.float32)],  # normalized negs
        compiler_params=pltpu.CompilerParams(
            dimension_semantics=("parallel", "arbitrary"),
            vmem_limit_bytes=_vmem_limit_bytes(tile_b, n, d)),
        cost_estimate=cost,
    )(mu_c_t, mu_n_t, negative_samples)

    pred = jnp.sum(pred_part[0, ::_LANES]) / (b * d)
    contr = jnp.sum(contr_part[0, ::_LANES]) / b
    return pred, contr


# --------------------------------------------------------------------------
# pure-JAX reference (for sanity checks)
# --------------------------------------------------------------------------
def _reference(mu_current, mu_next, negative_samples):
    pred = jnp.mean((mu_current - mu_next) ** 2)

    def norm(x):
        nrm = jnp.sqrt(jnp.sum(x * x, axis=-1, keepdims=True))
        return x / jnp.maximum(nrm, _EPS)

    mc, mn, ng = norm(mu_current), norm(mu_next), norm(negative_samples)
    pos = jnp.sum(mc * mn, axis=-1) / TEMPERATURE
    negs = (mc @ ng.T) / TEMPERATURE
    logits = jnp.concatenate([pos[:, None], negs], axis=1)
    ce = jnp.mean(jax.nn.logsumexp(logits, axis=-1) - logits[:, 0])
    return pred, ce


if __name__ == "__main__":
    key = jax.random.PRNGKey(0)
    k1, k2, k3, k4, k5, k6 = jax.random.split(key, 6)

    # Case 1: the module's documented shapes (batch=2, dim=16, n_neg=8).
    batch, dim, n_neg = 2, 16, 8
    mu_current = jax.random.normal(k1, (batch, dim), dtype=jnp.float32)
    mu_next = jax.random.normal(k2, (batch, dim), dtype=jnp.float32)
    negative_samples = jax.random.normal(k3, (n_neg, dim), dtype=jnp.float32)

    pred_loss, contr_loss = regime_prediction_loss(
        mu_current, mu_next, negative_samples)
    jax.block_until_ready((pred_loss, contr_loss))

    ref_pred, ref_contr = _reference(mu_current, mu_next, negative_samples)
    assert jnp.allclose(pred_loss, ref_pred, atol=1e-5, rtol=1e-4)
    assert jnp.allclose(contr_loss, ref_contr, atol=1e-5, rtol=1e-4)

    # negatives=None path (lane-dense MSE-only kernel).
    p_only, c_zero = regime_prediction_loss(mu_current, mu_next, None)
    jax.block_until_ready((p_only, c_zero))
    assert jnp.allclose(p_only, ref_pred, atol=1e-5, rtol=1e-4)
    assert float(c_zero) == 0.0

    # Case 2: awkward batch (not a multiple of 128) with a small tile hint ->
    # exercises zero-padding, in-kernel lane masking, the multi-step
    # "arbitrary" accumulation axis and the 2-way "parallel" core split.
    b2, n2 = 300, 24
    mu_c2 = jax.random.normal(k4, (b2, dim), dtype=jnp.float32)
    mu_n2 = jax.random.normal(k5, (b2, dim), dtype=jnp.float32)
    neg2 = jax.random.normal(k6, (n2, dim), dtype=jnp.float32)

    p2, c2 = regime_prediction_loss(mu_c2, mu_n2, neg2, batch_tile=128)
    jax.block_until_ready((p2, c2))
    rp2, rc2 = _reference(mu_c2, mu_n2, neg2)
    assert jnp.allclose(p2, rp2, atol=1e-5, rtol=1e-4)
    assert jnp.allclose(c2, rc2, atol=1e-5, rtol=1e-4)

    # Same shapes, default plan (single large tile, no core split).
    p3, c3 = regime_prediction_loss(mu_c2, mu_n2, neg2)
    jax.block_until_ready((p3, c3))
    assert jnp.allclose(p3, rp2, atol=1e-5, rtol=1e-4)
    assert jnp.allclose(c3, rc2, atol=1e-5, rtol=1e-4)

    p2_only, _ = regime_prediction_loss(mu_c2, mu_n2, None, batch_tile=128)
    jax.block_until_ready(p2_only)
    assert jnp.allclose(p2_only, rp2, atol=1e-5, rtol=1e-4)

    print("KERNEL_OK")
</pallas_src>

<mosaic_0001>
module attributes {stable_mosaic.version = 11 : i64} {
  func.func @_regime_loss_kernel(%arg0: i32, %arg1: i32, %arg2: memref<16x128xf32, #tpu.memory_space<vmem>>, %arg3: memref<16x128xf32, #tpu.memory_space<vmem>>, %arg4: memref<8x16xf32, #tpu.memory_space<vmem>>, %arg5: memref<1x128xf32, #tpu.memory_space<vmem>>, %arg6: memref<1x128xf32, #tpu.memory_space<vmem>>, %arg7: memref<8x16xf32, #tpu.memory_space<vmem>>) attributes {dimension_semantics = [#tpu.dimension_semantics<parallel>, #tpu.dimension_semantics<arbitrary>], iteration_bounds = array<i64: 1, 1>, scalar_prefetch = 0 : i64, scratch_operands = 1 : i64, tpu.core_type = #tpu.core_type<tc>, window_params = [{transform_indices = @transform_0, window_bounds = array<i64: 16, 128>}, {transform_indices = @transform_1, window_bounds = array<i64: 16, 128>}, {pipeline_mode = #tpu.pipeline_mode<synchronous>, transform_indices = @transform_2, window_bounds = array<i64: 8, 16>}, {transform_indices = @transform_3, window_bounds = array<i64: 1, 128>}, {transform_indices = @transform_4, window_bounds = array<i64: 1, 128>}]} {
    %c0_i32 = arith.constant 0 : i32
    %0 = arith.cmpi eq, %arg1, %c0_i32 : i32
    %1 = arith.extui %0 : i1 to i32
    %c0_i32_0 = arith.constant 0 : i32
    %2 = arith.cmpi ne, %1, %c0_i32_0 : i32
    scf.if %2 {
      %cst_25 = arith.constant 0.000000e+00 : f32
      %70 = vector.broadcast %cst_25 : f32 to vector<1x128xf32>
      %c0_26 = arith.constant 0 : index
      %c0_27 = arith.constant 0 : index
      %71 = vector.load %arg5[%c0_26, %c0_27] : memref<1x128xf32, #tpu.memory_space<vmem>>, vector<1x128xf32>
      tpu.vector_store %arg5[%c0_26, %c0_27], %70 {strides = array<i32>} : memref<1x128xf32, #tpu.memory_space<vmem>>, vector<1x128xf32>,
      %cst_28 = arith.constant 0.000000e+00 : f32
      %72 = vector.broadcast %cst_28 : f32 to vector<1x128xf32>
      %c0_29 = arith.constant 0 : index
      %c0_30 = arith.constant 0 : index
      %73 = vector.load %arg6[%c0_29, %c0_30] : memref<1x128xf32, #tpu.memory_space<vmem>>, vector<1x128xf32>
      tpu.vector_store %arg6[%c0_29, %c0_30], %72 {strides = array<i32>} : memref<1x128xf32, #tpu.memory_space<vmem>>, vector<1x128xf32>,
      %c0_31 = arith.constant 0 : index
      %c0_32 = arith.constant 0 : index
      %74 = vector.load %arg4[%c0_31, %c0_32] : memref<8x16xf32, #tpu.memory_space<vmem>>, vector<8x16xf32>
      %75 = arith.mulf %74, %74 : vector<8x16xf32>
      %cst_33 = arith.constant dense<0.000000e+00> : vector<8xf32>
      %76 = vector.multi_reduction <add>, %75, %cst_33 [1] : vector<8x16xf32> to vector<8xf32>
      %77 = vector.shape_cast %76 : vector<8xf32> to vector<8x1xf32>
      %cst_34 = arith.constant 1.000000e-24 : f32
      %78 = vector.broadcast %cst_34 : f32 to vector<8x1xf32>
      %79 = arith.maximumf %77, %78 : vector<8x1xf32>
      %80 = math.rsqrt %79 : vector<8x1xf32>
      %81 = vector.broadcast %80 : vector<8x1xf32> to vector<8x16xf32>
      %82 = arith.mulf %74, %81 : vector<8x16xf32>
      %c0_35 = arith.constant 0 : index
      %c0_36 = arith.constant 0 : index
      %83 = vector.load %arg7[%c0_35, %c0_36] : memref<8x16xf32, #tpu.memory_space<vmem>>, vector<8x16xf32>
      tpu.vector_store %arg7[%c0_35, %c0_36], %82 {strides = array<i32>} : memref<8x16xf32, #tpu.memory_space<vmem>>, vector<8x16xf32>,
    } else {
    }
    %c0 = arith.constant 0 : index
    %c0_1 = arith.constant 0 : index
    %3 = vector.load %arg2[%c0, %c0_1] : memref<16x128xf32, #tpu.memory_space<vmem>>, vector<16x128xf32>
    %c0_2 = arith.constant 0 : index
    %c0_3 = arith.constant 0 : index
    %4 = vector.load %arg3[%c0_2, %c0_3] : memref<16x128xf32, #tpu.memory_space<vmem>>, vector<16x128xf32>
    %5 = arith.subf %3, %4 : vector<16x128xf32>
    %6 = arith.mulf %5, %5 : vector<16x128xf32>
    %7 = vector.shape_cast %6 : vector<16x128xf32> to vector<1x16x128xf32>
    %cst = arith.constant dense<0.000000e+00> : vector<1xf32>
    %8 = vector.multi_reduction <add>, %7, %cst [1, 2] : vector<1x16x128xf32> to vector<1xf32>
    %9 = vector.shape_cast %8 : vector<1xf32> to vector<1x1x1xf32>
    %10 = vector.extract %9[0, 0, 0] : f32 from vector<1x1x1xf32>
    %11 = arith.mulf %3, %3 : vector<16x128xf32>
    %cst_4 = arith.constant dense<0.000000e+00> : vector<128xf32>
    %12 = vector.multi_reduction <add>, %11, %cst_4 [0] : vector<16x128xf32> to vector<128xf32>
    %13 = vector.shape_cast %12 : vector<128xf32> to vector<1x128xf32>
    %14 = arith.mulf %4, %4 : vector<16x128xf32>
    %cst_5 = arith.constant dense<0.000000e+00> : vector<128xf32>
    %15 = vector.multi_reduction <add>, %14, %cst_5 [0] : vector<16x128xf32> to vector<128xf32>
    %16 = vector.shape_cast %15 : vector<128xf32> to vector<1x128xf32>
    %cst_6 = arith.constant 1.000000e-24 : f32
    %17 = vector.broadcast %cst_6 : f32 to vector<1x128xf32>
    %18 = arith.maximumf %13, %17 : vector<1x128xf32>
    %19 = math.rsqrt %18 : vector<1x128xf32>
    %cst_7 = arith.constant 14.2857141 : f32
    %20 = vector.broadcast %cst_7 : f32 to vector<1x128xf32>
    %21 = arith.mulf %19, %20 : vector<1x128xf32>
    %22 = vector.broadcast %21 : vector<1x128xf32> to vector<16x128xf32>
    %23 = arith.mulf %3, %22 : vector<16x128xf32>
    %cst_8 = arith.constant 1.000000e-24 : f32
    %24 = vector.broadcast %cst_8 : f32 to vector<1x128xf32>
    %25 = arith.maximumf %16, %24 : vector<1x128xf32>
    %26 = math.rsqrt %25 : vector<1x128xf32>
    %27 = vector.broadcast %26 : vector<1x128xf32> to vector<16x128xf32>
    %28 = arith.mulf %4, %27 : vector<16x128xf32>
    %29 = arith.mulf %23, %28 : vector<16x128xf32>
    %cst_9 = arith.constant dense<0.000000e+00> : vector<128xf32>
    %30 = vector.multi_reduction <add>, %29, %cst_9 [0] : vector<16x128xf32> to vector<128xf32>
    %31 = vector.shape_cast %30 : vector<128xf32> to vector<1x128xf32>
    %c0_10 = arith.constant 0 : index
    %c0_11 = arith.constant 0 : index
    %32 = vector.load %arg7[%c0_10, %c0_11] : memref<8x16xf32, #tpu.memory_space<vmem>>, vector<8x16xf32>
    %cst_12 = arith.constant dense<0.000000e+00> : vector<8x128xf32>
    %33 = tpu.matmul %32, %23, %cst_12 {dimension_numbers = #tpu.dot_dimension_numbers<[1], [0], [0], [1], [0, 0, 1, 1], [], []>} : vector<8x16xf32>, vector<16x128xf32>, vector<8x128xf32> -> vector<8x128xf32>
    %cst_13 = arith.constant dense<0xFF800000> : vector<128xf32>
    %34 = vector.multi_reduction <maximumf>, %33, %cst_13 [0] : vector<8x128xf32> to vector<128xf32>
    %35 = vector.shape_cast %34 : vector<128xf32> to vector<1x128xf32>
    %36 = arith.maximumf %31, %35 : vector<1x128xf32>
    %37 = arith.subf %31, %36 : vector<1x128xf32>
    %38 = math.exp %37 : vector<1x128xf32>
    %39 = vector.broadcast %36 : vector<1x128xf32> to vector<8x128xf32>
    %40 = arith.subf %33, %39 : vector<8x128xf32>
    %41 = math.exp %40 : vector<8x128xf32>
    %cst_14 = arith.constant dense<0.000000e+00> : vector<128xf32>
    %42 = vector.multi_reduction <add>, %41, %cst_14 [0] : vector<8x128xf32> to vector<128xf32>
    %43 = vector.shape_cast %42 : vector<128xf32> to vector<1x128xf32>
    %44 = arith.addf %38, %43 : vector<1x128xf32>
    %45 = math.log %44 : vector<1x128xf32>
    %46 = arith.addf %36, %45 : vector<1x128xf32>
    %47 = arith.subf %46, %31 : vector<1x128xf32>
    %c1_i32 = arith.constant 1 : i32
    %48 = arith.muli %arg0, %c1_i32 : i32
    %49 = arith.addi %48, %arg1 : i32
    %c128_i32 = arith.constant 128 : i32
    %50 = arith.muli %49, %c128_i32 : i32
    %51 = tpu.iota {dimensions = array<i32: 1>} : vector<1x128xi32>
    %52 = vector.broadcast %50 : i32 to vector<1x128xi32>
    %53 = arith.addi %52, %51 : vector<1x128xi32>
    %c2_i32 = arith.constant 2 : i32
    %54 = vector.broadcast %c2_i32 : i32 to vector<1x128xi32>
    %55 = arith.cmpi slt, %53, %54 : vector<1x128xi32>
    %cst_15 = arith.constant 0.000000e+00 : f32
    %56 = vector.broadcast %cst_15 : f32 to vector<1x128xf32>
    %57 = arith.select %55, %47, %56 : vector<1x128xi1>, vector<1x128xf32>
    %c0_16 = arith.constant 0 : index
    %c0_17 = arith.constant 0 : index
    %58 = vector.load %arg5[%c0_16, %c0_17] : memref<1x128xf32, #tpu.memory_space<vmem>>, vector<1x128xf32>
    %59 = vector.broadcast %10 : f32 to vector<1x128xf32>
    %60 = arith.addf %58, %59 : vector<1x128xf32>
    %c0_18 = arith.constant 0 : index
    %c0_19 = arith.constant 0 : index
    %61 = vector.load %arg5[%c0_18, %c0_19] : memref<1x128xf32, #tpu.memory_space<vmem>>, vector<1x128xf32>
    tpu.vector_store %arg5[%c0_18, %c0_19], %60 {strides = array<i32>} : memref<1x128xf32, #tpu.memory_space<vmem>>, vector<1x128xf32>,
    %c0_20 = arith.constant 0 : index
    %c0_21 = arith.constant 0 : index
    %62 = vector.load %arg6[%c0_20, %c0_21] : memref<1x128xf32, #tpu.memory_space<vmem>>, vector<1x128xf32>
    %63 = vector.shape_cast %57 : vector<1x128xf32> to vector<1x1x128xf32>
    %cst_22 = arith.constant dense<0.000000e+00> : vector<1xf32>
    %64 = vector.multi_reduction <add>, %63, %cst_22 [1, 2] : vector<1x1x128xf32> to vector<1xf32>
    %65 = vector.shape_cast %64 : vector<1xf32> to vector<1x1x1xf32>
    %66 = vector.extract %65[0, 0, 0] : f32 from vector<1x1x1xf32>
    %67 = vector.broadcast %66 : f32 to vector<1x128xf32>
    %68 = arith.addf %62, %67 : vector<1x128xf32>
    %c0_23 = arith.constant 0 : index
    %c0_24 = arith.constant 0 : index
    %69 = vector.load %arg6[%c0_23, %c0_24] : memref<1x128xf32, #tpu.memory_space<vmem>>, vector<1x128xf32>
    tpu.vector_store %arg6[%c0_23, %c0_24], %68 {strides = array<i32>} : memref<1x128xf32, #tpu.memory_space<vmem>>, vector<1x128xf32>,
    return
  }
  func.func @transform_0(%arg0: i32, %arg1: i32) -> (i32, i32) {
    %c1_i32 = arith.constant 1 : i32
    %0 = arith.muli %arg0, %c1_i32 : i32
    %1 = arith.addi %0, %arg1 : i32
    %c0_i32 = arith.constant 0 : i32
    %c0_i32_0 = arith.constant 0 : i32
    return %c0_i32, %1 : i32, i32
  }
  func.func @transform_1(%arg0: i32, %arg1: i32) -> (i32, i32) {
    %c1_i32 = arith.constant 1 : i32
    %0 = arith.muli %arg0, %c1_i32 : i32
    %1 = arith.addi %0, %arg1 : i32
    %c0_i32 = arith.constant 0 : i32
    %c0_i32_0 = arith.constant 0 : i32
    return %c0_i32, %1 : i32, i32
  }
  func.func @transform_2(%arg0: i32, %arg1: i32) -> (i32, i32) {
    %c0_i32 = arith.constant 0 : i32
    %c0_i32_0 = arith.constant 0 : i32
    %c0_i32_1 = arith.constant 0 : i32
    return %c0_i32, %c0_i32_0 : i32, i32
  }
  func.func @transform_3(%arg0: i32, %arg1: i32) -> (i32, i32) {
    %c0_i32 = arith.constant 0 : i32
    %c0_i32_0 = arith.constant 0 : i32
    return %c0_i32, %arg0 : i32, i32
  }
  func.func @transform_4(%arg0: i32, %arg1: i32) -> (i32, i32) {
    %c0_i32 = arith.constant 0 : i32
    %c0_i32_0 = arith.constant 0 : i32
    return %c0_i32, %arg0 : i32, i32
  }
}

</mosaic_0001>

<bundles_post_ra>
// kernel: tpu_custom_call.1
= control target key start
LH: loop header
LB: loop body
LE: loop exit
PB: predicated region body
PF: predicated region fallthrough
CT: control target
= control target key end

     0   :  { %10 = vsyncpa [#allocation4], 0  ;;  %s554_s0 = inlined_call_operand.hbm [shape: f32[16,128], index: 0, kind: input, shape index: {}]   ;;  %s555_s1 = inlined_call_operand.hbm [shape: f32[16,128], index: 1, kind: input, shape index: {}]   ;;  %s556_s2 = inlined_call_operand.hbm [shape: f32[8,16], index: 2, kind: input, shape index: {}]   ;;  %s557_s3 = inlined_call_operand.hbm [shape: f32[1,128], index: 3, kind: output, shape index: {0}]   ;;  %s558_s4 = inlined_call_operand.hbm [shape: f32[1,128], index: 4, kind: output, shape index: {1}]  }
   0x1   :  { %11 = vsyncpa [#allocation7], 0 }
   0x2   :  { %12 = vsyncpa [#allocation5], 0 }
   0x3   :  { %13 = vsyncpa [#allocation11], 0  ;;  %s449_s15 = smov [#allocation6]   ;;  %s450_s17 = smov [#allocation3]  }
   0x4   :  { %s37_s16 = sshll.u32 %s449_s15, 4  ;;  %s22_s18 = sshll.u32 %s450_s17, 4  ;;  %s38_s16 = int_to_ptr.vmem [resolvable:$true] %s37_s16  ;;  %s484_s18 = int_to_ptr.vmem [resolvable:$true] %s22_s18 }
   0x5   :  { %s331_s21 = scalar_lea.hbm %s555_s1, 256 }
   0x6   :  { %p332_p0 = scmp.ne.s32.totalorder %s555_s1, %s331_s21  ;;  %p335_p1 = scmp.lt.u32.totalorder %s331_s21, %s555_s1 }
   0x8   :  { %p337_p2 = pnand %p335_p1, %p332_p0 }
   0xa   :  { %340 = shalt.err (!%p337_p2)
}
   0xb   :  { %s341_s26 = scalar_lea.vmem %s38_s16, 256  ;;  %p346_p4 = scmp.lt.s32.totalorder %s38_s16, %s38_s16 }
   0xc   :  { %p342_p3 = scmp.ne.s32.totalorder %s38_s16, %s341_s26  ;;  %p347_p5 = scmp.lt.s32.totalorder %s341_s26, %s341_s26 }
   0xe   :  { %p348_p6 = por %p347_p5, %p346_p4 }
  0x10   :  { %p349_p7 = pnand %p348_p6, %p342_p3 }
  0x12   :  { %352 = shalt.err (!%p349_p7)
}
  0x13   :  { %s451_s27 = smov 128   ;;  %s452_s28 = smov 8  }
  0x14   :  { %43 = dma.hbm_to_vmem [thread:$0]  %s555_s1, 256, %s38_s16, [#allocation7], %s451_s27, %s451_s27, %s452_s28  }
  0x15   :  { %s353_s7 = scalar_lea.hbm %s554_s0, 256 }
  0x16   :  { %p354_p8 = scmp.ne.s32.totalorder %s554_s0, %s353_s7  ;;  %p357_p9 = scmp.lt.u32.totalorder %s353_s7, %s554_s0 }
  0x18   :  { %p359_p10 = pnand %p357_p9, %p354_p8 }
  0x1a   :  { %362 = shalt.err (!%p359_p10)
}
  0x1b   :  { %s363_s12 = scalar_lea.vmem %s484_s18, 256  ;;  %p368_p12 = scmp.lt.s32.totalorder %s484_s18, %s484_s18 }
  0x1c   :  { %p364_p11 = scmp.ne.s32.totalorder %s484_s18, %s363_s12  ;;  %p369_p13 = scmp.lt.s32.totalorder %s363_s12, %s363_s12 }
  0x1e   :  { %p370_p0 = por %p369_p13, %p368_p12 }
  0x20   :  { %p371_p1 = pnand %p370_p0, %p364_p11 }
  0x22   :  { %374 = shalt.err (!%p371_p1)
}
  0x23   :  { %28 = dma.hbm_to_vmem [thread:$0]  %s554_s0, 256, %s484_s18, [#allocation4], %s451_s27, %s451_s27, %s452_s28  }
  0x24   :  { %s453_s14 = smov [#allocation8]   ;;  %s375_s19 = scalar_lea.hbm %s556_s2, 128 }
  0x25   :  { %s50_s15 = sshll.u32 %s453_s14, 4  ;;  %p376_p2 = scmp.ne.s32.totalorder %s556_s2, %s375_s19  ;;  %s51_s15 = int_to_ptr.vmem [resolvable:$true] %s50_s15 }
  0x26   :  { %p379_p3 = scmp.lt.u32.totalorder %s375_s19, %s556_s2 }
  0x28   :  { %p381_p4 = pnand %p379_p3, %p376_p2 }
  0x2a   :  { %384 = shalt.err (!%p381_p4)
}
  0x2b   :  { %s385_s24 = scalar_lea.vmem %s51_s15, 128  ;;  %p390_p6 = scmp.lt.s32.totalorder %s51_s15, %s51_s15 }
  0x2c   :  { %p386_p5 = scmp.ne.s32.totalorder %s51_s15, %s385_s24  ;;  %p391_p7 = scmp.lt.s32.totalorder %s385_s24, %s385_s24 }
  0x2e   :  { %p392_p8 = por %p391_p7, %p390_p6 }
  0x30   :  { %p393_p9 = pnand %p392_p8, %p386_p5 }
  0x32   :  { %396 = shalt.err (!%p393_p9)
}
  0x33   :  { %53 = dma.hbm_to_vmem [thread:$0]  %s556_s2, 128, %s51_s15, [#allocation7]  }
  0x34   :  { %441 = dma.done.wait [#allocation4], 256  }
  0x35   :  { %442 = vsyncadd [#allocation4], 4294967040 }
  0x36   :  { %443 = dma.done.wait [#allocation7], 384  }
  0x37   :  { %444 = vsyncadd [#allocation7], 4294966912  ;;  %v71_v0 = vld [vmem:[#allocation8] sm:$0xff]  ;;  %vm73_vm0 = vcmask 130048   ;;  %v82_v3 = vld [vmem:[#allocation3 + $0x8] sm:$0xff]  ;;  %v454_v19 = vmov 0.0|0.0  }
  0x38   :  { %v72_v1 = vmul.f32 %v71_v0, %v71_v0  ;;  %v81_v2 = vld [vmem:[#allocation3] sm:$0xff]  ;;  %v100_v6 = vmul.f32 %v82_v3, %v82_v3  ;;  %v83_v17 = vld [vmem:[#allocation6] sm:$0xff]  ;;  %v84_v18 = vld [vmem:[#allocation6 + $0x8] sm:$0xff]  ;;  %302 = vmatprep.subr.bf16.mxu0 %v454_v19  ;;  %v455_v24 = vmov 0.0   ;;  %vm456_vm1 = vmmov 0   ;;  %s457_s25 = smov [#allocation9]  }
  0x39   :  { %v99_v5 = vmul.f32 %v81_v2, %v81_v2  ;;  %v108_v20 = vmul.f32 %v83_v17, %v83_v17  ;;  %v109_v21 = vmul.f32 %v84_v18, %v84_v18  ;;  %69 = vst [vmem:[#allocation9] sm:$0x1] %v455_v24  ;;  %70 = vst [vmem:[#allocation10] sm:$0x1] %v455_v24  ;;  %299 = vmatprep.mubr.msk.f32.mxu0 %vm456_vm1, %v455_v24  ;;  %vm247_vm3 = vcmask 1040384   ;;  %s267_s26 = sshll.u32 %s457_s25, 4  ;;  %s268_s26 = int_to_ptr.vmem [resolvable:$true] %s267_s26 }
  0x3a   :  { %v74_v4 = vsel %vm73_vm0, %v72_v1, 0.0  ;;  %v85_v45 = vsub.f32 %v81_v2, %v83_v17  ;;  %v86_v46 = vsub.f32 %v82_v3, %v84_v18  ;;  %s397_s27 = scalar_lea.vmem %s268_s26, 16  ;;  %s401_s28 = scalar_lea.vmem %s268_s26, 32 }
  0x3b   :  { %75 = vadd.xlane.f32.xlu0 %v74_v4  ;;  %v101_v7 = vadd.f32 %v100_v6, %v99_v5  ;;  %v110_v25 = vadd.f32 %v109_v21, %v108_v20  ;;  %p398_p10 = scmp.ne.s32.totalorder %s268_s26, %s397_s27  ;;  %p402_p11 = scmp.lt.s32.totalorder %s268_s26, %s268_s26 }
  0x3c   :  { %v87_v47 = vmul.f32 %v85_v45, %v85_v45  ;;  %v88_v48 = vmul.f32 %v86_v46, %v86_v46  ;;  %p403_p12 = scmp.lt.s32.totalorder %s401_s28, %s397_s27 }
  0x3d   :  { %v102_v8 = vrot.slane %v101_v7, 4  ;;  %v111_v27 = vrot.slane %v110_v25, 4 }
  0x3e   :  { %v89_v49 = vadd.f32 %v88_v48, %v87_v47  ;;  %p404_p13 = por %p403_p12, %p402_p11 }
  0x3f   :  { %v103_v9 = vadd.f32 %v102_v8, %v101_v7  ;;  %v112_v28 = vadd.f32 %v111_v27, %v110_v25 }
  0x40   :  { %90 = vadd.xlane.f32.xlu0 %v89_v49  ;;  %p405_p0 = pnand %p404_p13, %p398_p10 }
  0x41   :  { %v104_v10 = vrot.slane %v103_v9, 2  ;;  %v113_v29 = vrot.slane %v112_v28, 2 }
  0x43   :  { %v105_v11 = vadd.f32 %v104_v10, %v103_v9  ;;  %v114_v30 = vadd.f32 %v113_v29, %v112_v28  ;;  %v242_v29 = vld [vmem:[#allocation9] sm:$0x1] }
  0x45   :  { %v106_v12 = vrot.slane %v105_v11, 1  ;;  %v115_v31 = vrot.slane %v114_v30, 1 }
  0x47   :  { %v107_v13 = vadd.f32 %v106_v12, %v105_v11  ;;  %v116_v32 = vadd.f32 %v115_v31, %v114_v30 }
  0x49   :  { %v117_v14 = vmax.f32 %v107_v13, 1e-24  ;;  %v122_v33 = vmax.f32 %v116_v32, 1e-24 }
  0x4b   :  { %319 = vrsqrt.f32 %v117_v14  ;;  %v236_v14 = vlaneseq }
  0x4c   :  { %321 = vrsqrt.f32 %v122_v33 }
  0x55   :  { %v320_v15 = vpop.eup %319 }
  0x56   :  { %v119_v16 = vmul.f32 14.285714, %v320_v15  ;;  %v322_v34 = vpop.eup %321 }
  0x57   :  { %v124_v35 = vmul.f32 %v322_v34, %v83_v17  ;;  %v125_v36 = vmul.f32 %v322_v34, %v84_v18 }
  0x58   :  { %v120_v22 = vmul.f32 %v119_v16, %v81_v2  ;;  %v121_v23 = vmul.f32 %v119_v16, %v82_v3  ;;  %v237_v16 = vand.u32 127, %v236_v14 }
  0x5a   :  { %v303_v26 = vpack.c.bf16 %v121_v23, %v120_v22  ;;  %v126_v37 = vmul.f32 %v124_v35, %v120_v22  ;;  %v127_v38 = vmul.f32 %v125_v36, %v121_v23  ;;  %vm240_vm2 = vcmp.lt.s32.totalorder %v237_v16, 2 }
  0x5c   :  { %304 = vmatpush3.bf16.msra.mxu0 %v303_v26  ;;  %v128_v39 = vadd.f32 %v127_v38, %v126_v37 }
  0x5e   :  { %v129_v50 = vrot.slane %v128_v39, 4 }
  0x60   :  { %v130_v51 = vadd.f32 %v129_v50, %v128_v39 }
  0x62   :  { %v131_v52 = vrot.slane %v130_v51, 2 }
  0x64   :  { %v132_v54 = vadd.f32 %v131_v52, %v130_v51 }
  0x66   :  { %v133_v58 = vrot.slane %v132_v54, 1 }
  0x68   :  { %v134_v61 = vadd.f32 %v133_v58, %v132_v54 }
  0xc8   :  { %v76_v40 = vpop.xlane.xlu0 %75 }
  0xc9   :  { %v77_v41 = vmax.f32 %v76_v40, 1e-24 }
  0xcb   :  { %323 = vrsqrt.f32 %v77_v41 }
  0xcd   :  { %v91_v22 = vpop.xlane.xlu0 %90 }
  0xce   :  { %v92_v23 = vrot.slane %v91_v22, 4 }
  0xd0   :  { %v93_v24 = vadd.f32 %v92_v23, %v91_v22 }
  0xd2   :  { %v94_v25 = vrot.slane %v93_v24, 2 }
  0xd4   :  { %v95_v26 = vadd.f32 %v94_v25, %v93_v24 }
  0xd5   :  { %v324_v42 = vpop.eup %323 }
  0xd6   :  { %v79_v43 = vmul.f32 %v324_v42, %v71_v0  ;;  %v96_v27 = vrot.slane %v95_v26, 1 }
  0xd8   :  { %80 = vst.msk [vmem:[#allocation2] sm:$0xff] %vm73_vm0, %v79_v43  ;;  %v97_v28 = vadd.f32 %v96_v27, %v95_v26 }
  0xda   :  { %305 = vpush %v97_v28 }
  0xdf   :  { %v135_v44 = vld [vmem:[#allocation2] sm:$0xff] }
  0xe0   :  { %300 = vmatmul.mubr.msk.f32.vlgmr.msra.gmra.mrb[0].mxu0 %vm73_vm0, %v135_v44 }
 0x10b   :  { %s306_s2 = spop %305 }
 0x10c   :  { %v243_v30 = vstv %s306_s2 }
 0x10d   :  { %v244_v31 = vadd.f32 %v243_v30, %v242_v29 }
 0x10f   :  { %245 = vst [vmem:[#allocation9] sm:$0x1] %v244_v31 }
 0x1b3   :  { %v206_v53 = vpop.f32.mrb[0].mxu0 }
 0x1b4   :  { %v210_v55 = vrot.slane %v206_v53, 4  ;;  %v301_v56 = vpop.f32.mrb[1].mxu0 }
 0x1b6   :  { %v211_v57 = vmax.f32 %v206_v53, %v210_v55 }
 0x1b8   :  { %v212_v59 = vrot.slane %v211_v57, 2 }
 0x1ba   :  { %v213_v60 = vmax.f32 %v211_v57, %v212_v59 }
 0x1bc   :  { %v214_v62 = vrot.slane %v213_v60, 1 }
 0x1be   :  { %v215_v63 = vmax.f32 %v213_v60, %v214_v62 }
 0x1c0   :  { %v216_v0 = vmax.f32 %v134_v61, %v215_v63 }
 0x1c2   :  { %v217_v1 = vsub.f32 %v134_v61, %v216_v0  ;;  %v220_v2 = vsub.f32 %v206_v53, %v216_v0 }
 0x1c4   :  { %v221_v3 = vmul.f32 1.442695, %v220_v2  ;;  %v218_v4 = vmul.f32 1.442695, %v217_v1 }
 0x1c6   :  { %325 = vpow2.f32 %v221_v3 }
 0x1c7   :  { %327 = vpow2.f32 %v218_v4 }
 0x1d0   :  { %v326_v5 = vpop.eup %325 }
 0x1d1   :  { %v223_v6 = vrot.slane %v326_v5, 4  ;;  %v328_v12 = vpop.eup %327 }
 0x1d3   :  { %v224_v7 = vadd.f32 %v326_v5, %v223_v6 }
 0x1d5   :  { %v225_v8 = vrot.slane %v224_v7, 2 }
 0x1d7   :  { %v226_v9 = vadd.f32 %v225_v8, %v224_v7 }
 0x1d9   :  { %v227_v10 = vrot.slane %v226_v9, 1 }
 0x1db   :  { %v228_v11 = vadd.f32 %v227_v10, %v226_v9 }
 0x1dd   :  { %v229_v13 = vadd.f32 %v328_v12, %v228_v11 }
 0x1df   :  { %329 = vlog2.f32 %v229_v13 }
 0x1e9   :  { %v330_v15 = vpop.eup %329 }
 0x1ea   :  { %v231_v17 = vmul.f32 0.6931472, %v330_v15 }
 0x1ec   :  { %v232_v18 = vadd.f32 %v231_v17, %v216_v0 }
 0x1ee   :  { %v233_v19 = vsub.f32 %v232_v18, %v134_v61 }
 0x1f0   :  { %v241_v20 = vsel %vm240_vm2, %v233_v19, 0.0 }
 0x1f1   :  { %v248_v21 = vsel %vm247_vm3, %v241_v20, 0.0 }
 0x1f2   :  { %249 = vadd.xlane.f32.xlu1 %v248_v21 }
 0x1f3   :  { %408 = shalt.err (!%p405_p0)
}
 0x1f4   :  { %s409_s5 = scalar_lea.hbm %s557_s3, 16 }
 0x1f5   :  { %p410_p1 = scmp.ne.s32.totalorder %s557_s3, %s409_s5  ;;  %p413_p2 = scmp.lt.u32.totalorder %s409_s5, %s557_s3 }
 0x1f7   :  { %p415_p3 = pnand %p413_p2, %p410_p1 }
 0x1f9   :  { %418 = shalt.err (!%p415_p3)
}
 0x1fa   :  { %270 = dma.vmem_to_hbm [thread:$0]  %s268_s26, 16, %s557_s3, [#allocation5]   ;;  %v246_v39 = vld [vmem:[#allocation10] sm:$0x1] }
 0x1fb   :  { %s458_s12 = smov [#allocation10]  }
 0x1fc   :  { %s277_s1 = sshll.u32 %s458_s12, 4  ;;  %s278_s1 = int_to_ptr.vmem [resolvable:$true] %s277_s1 }
 0x1fd   :  { %s419_s14 = scalar_lea.vmem %s278_s1, 16  ;;  %s423_s15 = scalar_lea.vmem %s278_s1, 32 }
 0x1fe   :  { %p420_p4 = scmp.ne.s32.totalorder %s278_s1, %s419_s14  ;;  %p424_p5 = scmp.lt.s32.totalorder %s278_s1, %s278_s1 }
 0x1ff   :  { %p425_p6 = scmp.lt.s32.totalorder %s423_s15, %s419_s14 }
 0x201   :  { %p426_p7 = por %p425_p6, %p424_p5 }
 0x203   :  { %p427_p8 = pnand %p426_p7, %p420_p4 }
 0x27f   :  { %v250_v32 = vpop.xlane.xlu1 %249 }
 0x280   :  { %v251_v33 = vrot.slane %v250_v32, 4 }
 0x282   :  { %v252_v34 = vadd.f32 %v251_v33, %v250_v32 }
 0x284   :  { %v253_v35 = vrot.slane %v252_v34, 2 }
 0x286   :  { %v254_v36 = vadd.f32 %v253_v35, %v252_v34 }
 0x288   :  { %v255_v37 = vrot.slane %v254_v36, 1 }
 0x28a   :  { %v256_v38 = vadd.f32 %v255_v37, %v254_v36 }
 0x28c   :  { %307 = vpush %v256_v38 }
 0x2bd   :  { %s308_s13 = spop %307 }
 0x2be   :  { %v258_v40 = vstv %s308_s13 }
 0x2bf   :  { %v259_v41 = vadd.f32 %v258_v40, %v246_v39 }
 0x2c1   :  { %260 = vst [vmem:[#allocation10] sm:$0x1] %v259_v41 }
 0x2c2   :  { %430 = shalt.err (!%p427_p8)
}
 0x2c3   :  { %s431_s17 = scalar_lea.hbm %s558_s4, 16 }
 0x2c4   :  { %p432_p9 = scmp.ne.s32.totalorder %s558_s4, %s431_s17  ;;  %p435_p10 = scmp.lt.u32.totalorder %s431_s17, %s558_s4 }
 0x2c6   :  { %p437_p11 = pnand %p435_p10, %p432_p9 }
 0x2c8   :  { %440 = shalt.err (!%p437_p11)
}
 0x2c9   :  { %280 = dma.vmem_to_hbm [thread:$0]  %s278_s1, 16, %s558_s4, [#allocation11]  }
 0x2ca   :  { %445 = dma.done.wait [#allocation5], 16  }
 0x2cb   :  { %446 = vsyncadd [#allocation5], 4294967280 }
 0x2cc   :  { %447 = dma.done.wait [#allocation11], 16  }
 0x2cd   :  { %448 = vsyncadd [#allocation11], 4294967280 }
 0x2ce   :  { %287 = vsyncpa [#allocation4], 1 }
 0x2cf   :  { %288 = vsyncpa [#allocation7], 1 }
 0x2d0   :  { %289 = vsyncpa [#allocation5], 1 }
 0x2d1   :  { %290 = vsyncpa [#allocation11], 1 }

</bundles_post_ra>
